<compile_context>
chip_gen: v5e
topology: v5e:2x2
jax: 0.10.0
libtpu: 0.0.40
codegen_flags: <defaults>
</compile_context>

<pallas_src>
import functools
import math
import numpy as np
import jax
import jax.numpy as jnp
from jax import lax
from jax.experimental import pallas as pl
from jax.experimental.pallas import tpu as pltpu


# ----------------------------------------------------------------------------
# Pallas kernel: space-time memory read (flash-attention style online softmax)
# ----------------------------------------------------------------------------

def _memory_kernel(qi_ref, mi_ref, mo_ref, out_ref, m_sc, l_sc, *, thw, tk, masked):
    """One (object, HW-tile, THW-tile) grid step.

    qi_ref : (1, tq, D_e)  query keys, pre-scaled by 1/sqrt(D_e), bf16, shared
                           across objects via index_map
    mi_ref : (1, D_e, tk)  memory-key tile (bf16)
    mo_ref : (1, tk, D_o)  memory-value tile (bf16, THW-major -> plain dot)
    out_ref: (1, tq, D_o)  f32, resident across the THW axis: doubles as the
                           online-softmax accumulator, normalized at the end
    m_sc, l_sc : (tq, 1) f32 running max / running sum
    """
    k = pl.program_id(2)

    @pl.when(k == 0)
    def _():
        m_sc[...] = jnp.full_like(m_sc, -jnp.inf)
        l_sc[...] = jnp.zeros_like(l_sc)
        out_ref[...] = jnp.zeros_like(out_ref)

    q = qi_ref[0]            # (tq, D_e)  bf16 (already scaled)
    mi = mi_ref[0]           # (D_e, tk)  bf16
    mo = mo_ref[0]           # (tk, D_o)  bf16

    s = jnp.dot(q, mi, preferred_element_type=jnp.float32)        # (tq, tk) f32
    if masked:
        # padded THW columns -> -inf so they contribute nothing to the softmax
        col = k * tk + lax.broadcasted_iota(jnp.int32, s.shape, 1)
        s = jnp.where(col < thw, s, -jnp.inf)

    m_prev = m_sc[...]
    m_new = jnp.maximum(m_prev, jnp.max(s, axis=-1, keepdims=True))
    alpha = jnp.exp(m_prev - m_new)
    p = jnp.exp(s - m_new)                                         # (tq, tk) f32

    l_sc[...] = alpha * l_sc[...] + jnp.sum(p, axis=-1, keepdims=True)
    pv = jnp.dot(p.astype(mo.dtype), mo, preferred_element_type=jnp.float32)
    out_ref[0] = alpha * out_ref[0] + pv                           # (tq, D_o)
    m_sc[...] = m_new

    @pl.when(k == pl.num_programs(2) - 1)
    def _():
        out_ref[0] = out_ref[0] * pl.reciprocal(l_sc[...], approx=False)


def _pick_hw_tile(hw, cap=256):
    """Largest multiple-of-8 divisor of HW (<= cap); else a single full tile."""
    start = (min(cap, hw) // 8) * 8
    for cand in range(start, 7, -8):
        if hw % cand == 0:
            return cand
    return hw


def _pick_thw_tile(thw, tq, d_e, d_o, budget, cap):
    """VMEM-aware THW tile.  Returns (tk, padded_thw, masked)."""
    def vmem_est(tk):
        bf16, f32 = 2, 4
        return (2 * d_e * tk * bf16 + 2 * tk * d_o * bf16     # double-buffered key/value tiles
                + 2 * tq * d_e * bf16 + 2 * tq * d_o * f32    # query + resident output blocks
                + 2 * tq * 128 * f32)                         # m/l scratch (lane padded)
    tk = max(128, (cap // 128) * 128)
    while tk > 128 and vmem_est(tk) > budget:
        tk -= 128
    if thw <= tk:
        return thw, thw, False                                # single tile, no padding
    thw_pad = ((thw + tk - 1) // tk) * tk
    return tk, thw_pad, thw_pad != thw


def memory_read(m_in, m_out, q_in, q_out, *, tk_cap=2048, vmem_budget=28 << 20):
    """Memory.forward read-out.  Returns mem_out = cat([read, q_out], dim=1).

    The attention map `p` of the reference module is never consumed by
    STM.segment, so it is not materialized.
    """
    B, D_e, T, H, W = m_in.shape
    D_o = m_out.shape[1]
    THW, HW = T * H * W, H * W

    tq = _pick_hw_tile(HW)
    tk, thw_pad, masked = _pick_thw_tile(THW, tq, D_e, D_o, vmem_budget, tk_cap)
    n_q, n_k = HW // tq, thw_pad // tk

    # keys stay D-major, values are fed THW-major so P@V is a plain dot.
    mi = m_in.reshape(B, D_e, THW)
    mo = jnp.transpose(m_out.reshape(B, D_o, THW), (0, 2, 1))       # (B, THW, D_o)
    if mi.dtype != jnp.bfloat16:      # no-op if the bank is already cached in bf16
        mi = mi.astype(jnp.bfloat16)
    if mo.dtype != jnp.bfloat16:
        mo = mo.astype(jnp.bfloat16)
    if masked:
        mi = jnp.pad(mi, ((0, 0), (0, 0), (0, thw_pad - THW)))
        mo = jnp.pad(mo, ((0, 0), (0, thw_pad - THW), (0, 0)))
    # TODO(synk): store v4 THW-major in bf16 at memorize time to skip this
    # per-segment transpose of the value bank entirely.

    # 1/sqrt(D_e) folded into the (tiny) query once, query shared across objects
    scale = 1.0 / math.sqrt(D_e)
    qi = (jnp.transpose(q_in.reshape(1, D_e, HW), (0, 2, 1)).astype(jnp.float32)
          * scale).astype(jnp.bfloat16)

    mem_t = pl.pallas_call(
        functools.partial(_memory_kernel, thw=THW, tk=tk, masked=masked),
        out_shape=jax.ShapeDtypeStruct((B, HW, D_o), jnp.float32),
        grid=(B, n_q, n_k),
        in_specs=[
            # query: same block for every object (no broadcast copies)
            pl.BlockSpec((1, tq, D_e), lambda b, q, k: (0, q, 0)),
            pl.BlockSpec((1, D_e, tk), lambda b, q, k: (b, 0, k)),
            pl.BlockSpec((1, tk, D_o), lambda b, q, k: (b, k, 0)),
        ],
        out_specs=pl.BlockSpec((1, tq, D_o), lambda b, q, k: (b, q, 0)),
        scratch_shapes=[
            pltpu.VMEM((tq, 1), jnp.float32),     # running max
            pltpu.VMEM((tq, 1), jnp.float32),     # running sum
        ],
        compiler_params=pltpu.CompilerParams(
            dimension_semantics=("parallel", "parallel", "arbitrary"),
            vmem_limit_bytes=48 << 20),
    )(qi, mi, mo)

    mem = jnp.transpose(mem_t, (0, 2, 1)).reshape(B, D_o, H, W)
    q_out_b = jnp.broadcast_to(q_out.astype(mem.dtype), (B,) + q_out.shape[1:])
    return jnp.concatenate([mem, q_out_b], axis=1)


def _memory_read_ref(m_in, m_out, q_in, q_out):
    """Pure-JAX reference of Memory.forward (for the in-script tolerance check)."""
    B, D_e, T, H, W = m_in.shape
    D_o = m_out.shape[1]
    THW, HW = T * H * W, H * W
    mi = jnp.transpose(m_in.reshape(B, D_e, THW), (0, 2, 1))
    qi = jnp.broadcast_to(q_in.reshape(1, D_e, HW), (B, D_e, HW))
    p = jnp.einsum('bte,beh->bth', mi, qi) / math.sqrt(D_e)
    p = jax.nn.softmax(p, axis=1)
    mo = m_out.reshape(B, D_o, THW)
    mem = jnp.einsum('bot,bth->boh', mo, p).reshape(B, D_o, H, W)
    q_out_b = jnp.broadcast_to(q_out, (B,) + q_out.shape[1:])
    return jnp.concatenate([mem, q_out_b], axis=1)


# ----------------------------------------------------------------------------
# Pallas kernel: Soft_aggregation (tiled over lane-dense HW blocks)
# ----------------------------------------------------------------------------

def _soft_agg_kernel(ps_ref, logit_ref):
    ps = ps_ref[...]                       # (num_objects, tile)
    no, t = ps.shape
    K = logit_ref.shape[0]

    bg = jnp.ones((1, t), ps.dtype)
    for i in range(no):                    # static unroll (num_objects small & static)
        bg = bg * (1.0 - ps[i:i + 1, :])

    def _logit(em):
        em = jnp.clip(em, 1e-7, 1.0 - 1e-7)
        return jnp.log(em / (1.0 - em))

    logit_ref[0:1, :] = _logit(bg)
    logit_ref[1:1 + no, :] = _logit(ps)
    if K > 1 + no:
        zero_logit = math.log(1e-7 / (1.0 - 1e-7))   # clamp(0) -> 1e-7
        logit_ref[1 + no:K, :] = jnp.full((K - 1 - no, t), zero_logit, ps.dtype)


def _pick_lane_tile(hw, cap=2048):
    t = min(cap, (hw // 128) * 128)
    while t >= 128:
        if hw % t == 0:
            return t
        t -= 128
    return hw


def soft_aggregation(ps, K):
    no, H, W = ps.shape
    hw = H * W
    tile = _pick_lane_tile(hw)
    logit = pl.pallas_call(
        _soft_agg_kernel,
        out_shape=jax.ShapeDtypeStruct((K, hw), jnp.float32),
        grid=(hw // tile,),
        in_specs=[pl.BlockSpec((no, tile), lambda i: (0, i))],
        out_specs=pl.BlockSpec((K, tile), lambda i: (0, i)),
        compiler_params=pltpu.CompilerParams(dimension_semantics=("parallel",)),
    )(ps.reshape(no, hw).astype(jnp.float32))
    return logit.reshape(1, K, H, W)


# ----------------------------------------------------------------------------
# Plain-JAX glue: params, conv, BN, ResNet-50 trunk, Decoder, etc.
# ----------------------------------------------------------------------------

class _ParamFactory:
    def __init__(self, seed=0):
        self._key = jax.random.PRNGKey(seed)

    def _next(self):
        self._key, sub = jax.random.split(self._key)
        return sub

    def conv(self, cin, cout, k, bias=True):
        fan_in = cin * k * k
        w = jax.random.normal(self._next(), (cout, cin, k, k), jnp.float32) / np.sqrt(fan_in)
        b = jnp.zeros((cout,), jnp.float32) if bias else None
        return {'w': w, 'b': b}

    def bn(self, c):
        return {'gamma': jnp.ones((c,), jnp.float32),
                'beta': jnp.zeros((c,), jnp.float32),
                'mean': jnp.zeros((c,), jnp.float32),
                'var': jnp.ones((c,), jnp.float32)}


def conv2d(x, p, stride=1, padding=0):
    out = lax.conv_general_dilated(
        x, p['w'], (stride, stride),
        ((padding, padding), (padding, padding)),
        dimension_numbers=('NCHW', 'OIHW', 'NCHW'))
    if p['b'] is not None:
        out = out + p['b'][None, :, None, None]
    return out


def batchnorm(x, p, eps=1e-5):
    inv = p['gamma'] / jnp.sqrt(p['var'] + eps)
    return x * inv[None, :, None, None] + (p['beta'] - p['mean'] * inv)[None, :, None, None]


def relu(x):
    return jnp.maximum(x, 0.0)


def maxpool_3x3_s2(x):
    return lax.reduce_window(x, -jnp.inf, lax.max,
                             (1, 1, 3, 3), (1, 1, 2, 2),
                             ((0, 0), (0, 0), (1, 1), (1, 1)))


def upsample_bilinear(x, scale):
    # F.interpolate(..., mode='bilinear', align_corners=False)  (half-pixel)
    N, C, H, W = x.shape
    return jax.image.resize(x, (N, C, H * scale, W * scale), method='bilinear')


_MEAN = jnp.array([0.485, 0.456, 0.406], jnp.float32).reshape(1, 3, 1, 1)
_STD = jnp.array([0.229, 0.224, 0.225], jnp.float32).reshape(1, 3, 1, 1)


# ---- ResNet-50 trunk (conv1 .. layer3), torchvision bottleneck V1.5 --------

def _init_bottleneck(pf, inplanes, planes, stride, downsample):
    p = {'conv1': pf.conv(inplanes, planes, 1, bias=False), 'bn1': pf.bn(planes),
         'conv2': pf.conv(planes, planes, 3, bias=False), 'bn2': pf.bn(planes),
         'conv3': pf.conv(planes, planes * 4, 1, bias=False), 'bn3': pf.bn(planes * 4),
         'stride': stride}
    if downsample:
        p['down_conv'] = pf.conv(inplanes, planes * 4, 1, bias=False)
        p['down_bn'] = pf.bn(planes * 4)
    return p


def _bottleneck_fwd(p, x):
    out = relu(batchnorm(conv2d(x, p['conv1']), p['bn1']))
    out = relu(batchnorm(conv2d(out, p['conv2'], stride=p['stride'], padding=1), p['bn2']))
    out = batchnorm(conv2d(out, p['conv3']), p['bn3'])
    if 'down_conv' in p:
        identity = batchnorm(conv2d(x, p['down_conv'], stride=p['stride']), p['down_bn'])
    else:
        identity = x
    return relu(out + identity)


def _init_res_layer(pf, inplanes, planes, blocks, stride):
    layer = [_init_bottleneck(pf, inplanes, planes, stride, downsample=True)]
    for _ in range(blocks - 1):
        layer.append(_init_bottleneck(pf, planes * 4, planes, 1, downsample=False))
    return layer


def _res_layer_fwd(layer, x):
    for blk in layer:
        x = _bottleneck_fwd(blk, x)
    return x


def init_resnet_trunk(pf):
    return {'conv1': pf.conv(3, 64, 7, bias=False), 'bn1': pf.bn(64),
            'layer1': _init_res_layer(pf, 64, 64, 3, 1),
            'layer2': _init_res_layer(pf, 256, 128, 4, 2),
            'layer3': _init_res_layer(pf, 512, 256, 6, 2)}


def encoder_q_fwd(p, in_f):
    f = (in_f - _MEAN) / _STD
    x = conv2d(f, p['conv1'], stride=2, padding=3)
    x = batchnorm(x, p['bn1'])
    c1 = relu(x)
    x = maxpool_3x3_s2(c1)
    r2 = _res_layer_fwd(p['layer1'], x)
    r3 = _res_layer_fwd(p['layer2'], r2)
    r4 = _res_layer_fwd(p['layer3'], r3)
    return r4, r3, r2, c1, f


def init_encoder_m(pf):
    p = init_resnet_trunk(pf)
    p['conv1_m'] = pf.conv(1, 64, 7, bias=False)
    p['conv1_o'] = pf.conv(1, 64, 7, bias=False)
    return p


def encoder_m_fwd(p, in_f, in_m, in_o):
    f = (in_f - _MEAN) / _STD
    m = in_m[:, None].astype(jnp.float32)
    o = in_o[:, None].astype(jnp.float32)
    x = (conv2d(f, p['conv1'], stride=2, padding=3)
         + conv2d(m, p['conv1_m'], stride=2, padding=3)
         + conv2d(o, p['conv1_o'], stride=2, padding=3))
    x = batchnorm(x, p['bn1'])
    c1 = relu(x)
    x = maxpool_3x3_s2(c1)
    r2 = _res_layer_fwd(p['layer1'], x)
    r3 = _res_layer_fwd(p['layer2'], r2)
    r4 = _res_layer_fwd(p['layer3'], r3)
    return r4, r3, r2, c1, f


# ---- KeyValue / ResBlock / Refine / Decoder --------------------------------

def init_keyvalue(pf, indim, keydim, valdim):
    return {'key': pf.conv(indim, keydim, 3), 'value': pf.conv(indim, valdim, 3)}


def keyvalue_fwd(p, x):
    return conv2d(x, p['key'], padding=1), conv2d(x, p['value'], padding=1)


def init_resblock(pf, indim, outdim=None, stride=1):
    if outdim is None:
        outdim = indim
    p = {'conv1': pf.conv(indim, outdim, 3), 'conv2': pf.conv(outdim, outdim, 3),
         'stride': stride}
    if not (indim == outdim and stride == 1):
        p['downsample'] = pf.conv(indim, outdim, 3)
    return p


def resblock_fwd(p, x):
    r = conv2d(relu(x), p['conv1'], stride=p['stride'], padding=1)
    r = conv2d(relu(r), p['conv2'], padding=1)
    if 'downsample' in p:
        x = conv2d(x, p['downsample'], stride=p['stride'], padding=1)
    return x + r


def init_refine(pf, inplanes, planes):
    return {'convFS': pf.conv(inplanes, planes, 3),
            'ResFS': init_resblock(pf, planes),
            'ResMM': init_resblock(pf, planes)}


def refine_fwd(p, f, pm, scale_factor=2):
    s = resblock_fwd(p['ResFS'], conv2d(f, p['convFS'], padding=1))
    m = s + upsample_bilinear(pm, scale_factor)
    return resblock_fwd(p['ResMM'], m)


def init_decoder(pf, mdim):
    return {'convFM': pf.conv(1024, mdim, 3), 'ResMM': init_resblock(pf, mdim),
            'RF3': init_refine(pf, 512, mdim), 'RF2': init_refine(pf, 256, mdim),
            'pred2': pf.conv(mdim, 2, 3)}


def decoder_fwd(p, r4, r3, r2):
    m4 = resblock_fwd(p['ResMM'], conv2d(r4, p['convFM'], padding=1))
    m3 = refine_fwd(p['RF3'], r3, m4)
    m2 = refine_fwd(p['RF2'], r2, m3)
    p2 = conv2d(relu(m2), p['pred2'], padding=1)
    return upsample_bilinear(p2, 4)


# ---- STM --------------------------------------------------------------------

def pad_divide_by(in_list, d, in_size):
    h, w = in_size
    new_h = h + (d - h % d) % d
    new_w = w + (d - w % d) % d
    lh, uh = (new_h - h) // 2, (new_h - h) - (new_h - h) // 2
    lw, uw = (new_w - w) // 2, (new_w - w) - (new_w - w) // 2
    pad_array = (int(lw), int(uw), int(lh), int(uh))
    out = [jnp.pad(x, ((0, 0),) * (x.ndim - 2) + ((lh, uh), (lw, uw))) for x in in_list]
    return out, pad_array


def init_stm(seed=0):
    pf = _ParamFactory(seed)
    return {'Encoder_M': init_encoder_m(pf),
            'Encoder_Q': init_resnet_trunk(pf),
            'KV_M_r4': init_keyvalue(pf, 1024, 128, 512),
            'KV_Q_r4': init_keyvalue(pf, 1024, 128, 512),
            'Decoder': init_decoder(pf, 256)}


def pad_memory(mems, num_objects, K):
    # Memory bank is cached in bf16 (halves HBM traffic on every segment call).
    pad_mems = []
    for mem in mems:
        mem = mem.astype(jnp.bfloat16)
        pad = jnp.zeros((1, K, mem.shape[1], 1, mem.shape[2], mem.shape[3]), mem.dtype)
        pad = pad.at[0, 1:num_objects + 1, :, 0].set(mem)
        pad_mems.append(pad)
    return pad_mems


def stm_memorize(params, frame, masks, num_objects):
    # NOTE: concretizes num_objects (matches torch's .item()); not jit-traceable.
    num_objects = int(num_objects[0])
    _, K, H, W = masks.shape
    (frame, masks), _ = pad_divide_by([frame, masks], 16, (frame.shape[2], frame.shape[3]))
    B_f, B_m, B_o = [], [], []
    for o in range(1, num_objects + 1):
        B_f.append(frame)
        B_m.append(masks[:, o])
        others = jnp.sum(masks[:, 1:o], axis=1) + jnp.sum(masks[:, o + 1:num_objects + 1], axis=1)
        B_o.append(jnp.clip(others, 0.0, 1.0))
    f = jnp.concatenate(B_f, axis=0)
    m = jnp.concatenate(B_m, axis=0)
    o_ = jnp.concatenate(B_o, axis=0)
    r4, _, _, _, _ = encoder_m_fwd(params['Encoder_M'], f, m, o_)
    k4, v4 = keyvalue_fwd(params['KV_M_r4'], r4)
    k4, v4 = pad_memory([k4, v4], num_objects=num_objects, K=K)
    return k4, v4


def stm_segment(params, frame, keys, values, num_objects):
    # NOTE: concretizes num_objects (matches torch's .item()); not jit-traceable.
    num_objects = int(num_objects[0])
    _, K, _keydim, _T, _Hk, _Wk = keys.shape
    [frame], pad = pad_divide_by([frame], 16, (frame.shape[2], frame.shape[3]))
    r4, r3, r2, _, _ = encoder_q_fwd(params['Encoder_Q'], frame)
    k4, v4 = keyvalue_fwd(params['KV_Q_r4'], r4)
    # query key/value are NOT broadcast per object; the memory kernel re-uses
    # the single (1, ...) query block for every object via its index_map.
    m4 = memory_read(keys[0, 1:num_objects + 1], values[0, 1:num_objects + 1], k4, v4)
    r3e = jnp.broadcast_to(r3, (num_objects,) + r3.shape[1:])
    r2e = jnp.broadcast_to(r2, (num_objects,) + r2.shape[1:])
    logits = decoder_fwd(params['Decoder'], m4, r3e, r2e)
    ps = jax.nn.softmax(logits, axis=1)[:, 1]
    logit = soft_aggregation(ps, K)
    if pad[2] + pad[3] > 0:
        logit = logit[:, :, pad[2]:-pad[3], :]
    if pad[0] + pad[1] > 0:
        logit = logit[:, :, :, pad[0]:-pad[1]]
    return logit


def stm_forward(params, *args):
    if args[1].ndim > 4:
        return stm_segment(params, *args)
    return stm_memorize(params, *args)


# ----------------------------------------------------------------------------

if __name__ == "__main__":
    params = init_stm(seed=0)

    # ---- direct tolerance check of the memory-read kernel (masked tail path) --
    kq = jax.random.PRNGKey(0)
    c1, c2, c3, c4 = jax.random.split(kq, 4)
    no_t, De_t, Do_t, T_t, Ht, Wt = 2, 128, 512, 10, 4, 4      # THW=160 -> padded to 256
    m_in_t = jax.random.normal(c1, (no_t, De_t, T_t, Ht, Wt), jnp.float32)
    m_out_t = jax.random.normal(c2, (no_t, Do_t, T_t, Ht, Wt), jnp.float32)
    q_in_t = jax.random.normal(c3, (1, De_t, Ht, Wt), jnp.float32)
    q_out_t = jax.random.normal(c4, (1, Do_t, Ht, Wt), jnp.float32)
    got = memory_read(m_in_t, m_out_t, q_in_t, q_out_t, tk_cap=128)  # forces masked tiles
    ref = _memory_read_ref(m_in_t, m_out_t, q_in_t, q_out_t)
    got, ref = jax.block_until_ready((got, ref))
    err = float(np.max(np.abs(np.asarray(got) - np.asarray(ref))))
    assert err < 6e-2, f"memory_read mismatch, max abs err {err}"

    # ---- full STM segment path -------------------------------------------------
    H = W = 64          # divisible by 16 -> no pad; r4 spatial = 4x4
    K = 4               # max object slots (incl. background slot 0)
    T = 2               # memory frames
    num_objects = jnp.array([2], jnp.int32)

    key = jax.random.PRNGKey(0)
    k_frame, k_keys, k_vals = jax.random.split(key, 3)
    frame = jax.random.uniform(k_frame, (1, 3, H, W), jnp.float32)
    keys_mem = jax.random.normal(k_keys, (1, K, 128, T, H // 16, W // 16), jnp.float32)
    vals_mem = jax.random.normal(k_vals, (1, K, 512, T, H // 16, W // 16), jnp.float32)

    # segment path (args[1].ndim > 4), exercises the Pallas Memory + Soft_agg kernels
    logit = stm_forward(params, frame, keys_mem, vals_mem, num_objects)
    logit = jax.block_until_ready(logit)
    assert logit.shape == (1, K, H, W), logit.shape
    assert bool(jnp.all(jnp.isfinite(logit)))
    print("KERNEL_OK")
</pallas_src>

<mosaic_0001>
module attributes {stable_mosaic.version = 11 : i64} {
  func.func @_memory_kernel(%arg0: i32, %arg1: i32, %arg2: i32, %arg3: memref<1x16x128xbf16, #tpu.memory_space<vmem>>, %arg4: memref<1x128x128xbf16, #tpu.memory_space<vmem>>, %arg5: memref<1x128x512xbf16, #tpu.memory_space<vmem>>, %arg6: memref<1x16x512xf32, #tpu.memory_space<vmem>>, %arg7: memref<16x1xf32, #tpu.memory_space<vmem>>, %arg8: memref<16x1xf32, #tpu.memory_space<vmem>>) attributes {dimension_semantics = [#tpu.dimension_semantics<parallel>, #tpu.dimension_semantics<parallel>, #tpu.dimension_semantics<arbitrary>], iteration_bounds = array<i64: 2, 1, 2>, scalar_prefetch = 0 : i64, scratch_operands = 2 : i64, tpu.core_type = #tpu.core_type<tc>, window_params = [{transform_indices = @transform_0, window_bounds = array<i64: 1, 16, 128>}, {transform_indices = @transform_1, window_bounds = array<i64: 1, 128, 128>}, {transform_indices = @transform_2, window_bounds = array<i64: 1, 128, 512>}, {transform_indices = @transform_3, window_bounds = array<i64: 1, 16, 512>}]} {
    %c0_i32 = arith.constant 0 : i32
    %0 = arith.cmpi eq, %arg2, %c0_i32 : i32
    %1 = arith.extui %0 : i1 to i32
    %c0_i32_0 = arith.constant 0 : i32
    %2 = arith.cmpi ne, %1, %c0_i32_0 : i32
    scf.if %2 {
      %cst_28 = arith.constant 0xFF800000 : f32
      %47 = vector.broadcast %cst_28 : f32 to vector<16x1xf32>
      %c0_29 = arith.constant 0 : index
      %c0_30 = arith.constant 0 : index
      %48 = vector.load %arg7[%c0_29, %c0_30] : memref<16x1xf32, #tpu.memory_space<vmem>>, vector<16x1xf32>
      tpu.vector_store %arg7[%c0_29, %c0_30], %47 {strides = array<i32>} : memref<16x1xf32, #tpu.memory_space<vmem>>, vector<16x1xf32>,
      %cst_31 = arith.constant 0.000000e+00 : f32
      %49 = vector.broadcast %cst_31 : f32 to vector<16x1xf32>
      %c0_32 = arith.constant 0 : index
      %c0_33 = arith.constant 0 : index
      %50 = vector.load %arg8[%c0_32, %c0_33] : memref<16x1xf32, #tpu.memory_space<vmem>>, vector<16x1xf32>
      tpu.vector_store %arg8[%c0_32, %c0_33], %49 {strides = array<i32>} : memref<16x1xf32, #tpu.memory_space<vmem>>, vector<16x1xf32>,
      %cst_34 = arith.constant 0.000000e+00 : f32
      %51 = vector.broadcast %cst_34 : f32 to vector<1x16x512xf32>
      %c0_35 = arith.constant 0 : index
      %c0_36 = arith.constant 0 : index
      %c0_37 = arith.constant 0 : index
      %52 = vector.load %arg6[%c0_35, %c0_36, %c0_37] : memref<1x16x512xf32, #tpu.memory_space<vmem>>, vector<1x16x512xf32>
      tpu.vector_store %arg6[%c0_35, %c0_36, %c0_37], %51 {strides = array<i32>} : memref<1x16x512xf32, #tpu.memory_space<vmem>>, vector<1x16x512xf32>,
    } else {
    }
    %c0 = arith.constant 0 : index
    %c0_1 = arith.constant 0 : index
    %c0_2 = arith.constant 0 : index
    %3 = vector.load %arg3[%c0, %c0_1, %c0_2] : memref<1x16x128xbf16, #tpu.memory_space<vmem>>, vector<1x16x128xbf16>
    %4 = vector.shape_cast %3 : vector<1x16x128xbf16> to vector<16x128xbf16>
    %c0_3 = arith.constant 0 : index
    %c0_4 = arith.constant 0 : index
    %c0_5 = arith.constant 0 : index
    %5 = vector.load %arg4[%c0_3, %c0_4, %c0_5] : memref<1x128x128xbf16, #tpu.memory_space<vmem>>, vector<1x128x128xbf16>
    %6 = vector.shape_cast %5 : vector<1x128x128xbf16> to vector<128x128xbf16>
    %c0_6 = arith.constant 0 : index
    %c0_7 = arith.constant 0 : index
    %c0_8 = arith.constant 0 : index
    %7 = vector.load %arg5[%c0_6, %c0_7, %c0_8] : memref<1x128x512xbf16, #tpu.memory_space<vmem>>, vector<1x128x512xbf16>
    %8 = vector.shape_cast %7 : vector<1x128x512xbf16> to vector<128x512xbf16>
    %cst = arith.constant dense<0.000000e+00> : vector<16x128xf32>
    %9 = tpu.matmul %4, %6, %cst {dimension_numbers = #tpu.dot_dimension_numbers<[1], [0], [0], [1], [0, 0, 1, 1], [], []>} : vector<16x128xbf16>, vector<128x128xbf16>, vector<16x128xf32> -> vector<16x128xf32>
    %c128_i32 = arith.constant 128 : i32
    %10 = arith.muli %arg2, %c128_i32 : i32
    %11 = tpu.iota {dimensions = array<i32: 1>} : vector<16x128xi32>
    %12 = vector.broadcast %10 : i32 to vector<16x128xi32>
    %13 = arith.addi %12, %11 : vector<16x128xi32>
    %c160_i32 = arith.constant 160 : i32
    %14 = vector.broadcast %c160_i32 : i32 to vector<16x128xi32>
    %15 = arith.cmpi slt, %13, %14 : vector<16x128xi32>
    %cst_9 = arith.constant 0xFF800000 : f32
    %16 = vector.broadcast %cst_9 : f32 to vector<16x128xf32>
    %17 = arith.select %15, %9, %16 : vector<16x128xi1>, vector<16x128xf32>
    %c0_10 = arith.constant 0 : index
    %c0_11 = arith.constant 0 : index
    %18 = vector.load %arg7[%c0_10, %c0_11] : memref<16x1xf32, #tpu.memory_space<vmem>>, vector<16x1xf32>
    %cst_12 = arith.constant dense<0xFF800000> : vector<16xf32>
    %19 = vector.multi_reduction <maximumf>, %17, %cst_12 [1] : vector<16x128xf32> to vector<16xf32>
    %20 = vector.shape_cast %19 : vector<16xf32> to vector<16x1xf32>
    %21 = arith.maximumf %18, %20 : vector<16x1xf32>
    %22 = arith.subf %18, %21 : vector<16x1xf32>
    %23 = math.exp %22 : vector<16x1xf32>
    %24 = vector.broadcast %21 : vector<16x1xf32> to vector<16x128xf32>
    %25 = arith.subf %17, %24 : vector<16x128xf32>
    %26 = math.exp %25 : vector<16x128xf32>
    %c0_13 = arith.constant 0 : index
    %c0_14 = arith.constant 0 : index
    %27 = vector.load %arg8[%c0_13, %c0_14] : memref<16x1xf32, #tpu.memory_space<vmem>>, vector<16x1xf32>
    %28 = arith.mulf %23, %27 : vector<16x1xf32>
    %cst_15 = arith.constant dense<0.000000e+00> : vector<16xf32>
    %29 = vector.multi_reduction <add>, %26, %cst_15 [1] : vector<16x128xf32> to vector<16xf32>
    %30 = vector.shape_cast %29 : vector<16xf32> to vector<16x1xf32>
    %31 = arith.addf %28, %30 : vector<16x1xf32>
    %c0_16 = arith.constant 0 : index
    %c0_17 = arith.constant 0 : index
    %32 = vector.load %arg8[%c0_16, %c0_17] : memref<16x1xf32, #tpu.memory_space<vmem>>, vector<16x1xf32>
    tpu.vector_store %arg8[%c0_16, %c0_17], %31 {strides = array<i32>} : memref<16x1xf32, #tpu.memory_space<vmem>>, vector<16x1xf32>,
    %33 = arith.truncf %26 : vector<16x128xf32> to vector<16x128xbf16>
    %cst_18 = arith.constant dense<0.000000e+00> : vector<16x512xf32>
    %34 = tpu.matmul %33, %8, %cst_18 {dimension_numbers = #tpu.dot_dimension_numbers<[1], [0], [0], [1], [0, 0, 1, 1], [], []>} : vector<16x128xbf16>, vector<128x512xbf16>, vector<16x512xf32> -> vector<16x512xf32>
    %c0_19 = arith.constant 0 : index
    %c0_20 = arith.constant 0 : index
    %c0_21 = arith.constant 0 : index
    %35 = vector.load %arg6[%c0_19, %c0_20, %c0_21] : memref<1x16x512xf32, #tpu.memory_space<vmem>>, vector<1x16x512xf32>
    %36 = vector.shape_cast %35 : vector<1x16x512xf32> to vector<16x512xf32>
    %37 = vector.broadcast %23 : vector<16x1xf32> to vector<16x512xf32>
    %38 = arith.mulf %37, %36 : vector<16x512xf32>
    %39 = arith.addf %38, %34 : vector<16x512xf32>
    %c0_22 = arith.constant 0 : index
    %c0_23 = arith.constant 0 : index
    %c0_24 = arith.constant 0 : index
    %40 = vector.load %arg6[%c0_22, %c0_23, %c0_24] : memref<1x16x512xf32, #tpu.memory_space<vmem>>, vector<1x16x512xf32>
    %41 = vector.shape_cast %40 : vector<1x16x512xf32> to vector<16x512xf32>
    %42 = vector.shape_cast %39 : vector<16x512xf32> to vector<1x16x512xf32>
    tpu.vector_store %arg6[%c0_22, %c0_23, %c0_24], %42 {strides = array<i32>} : memref<1x16x512xf32, #tpu.memory_space<vmem>>, vector<1x16x512xf32>,
    %c0_25 = arith.constant 0 : index
    %c0_26 = arith.constant 0 : index
    %43 = vector.load %arg7[%c0_25, %c0_26] : memref<16x1xf32, #tpu.memory_space<vmem>>, vector<16x1xf32>
    tpu.vector_store %arg7[%c0_25, %c0_26], %21 {strides = array<i32>} : memref<16x1xf32, #tpu.memory_space<vmem>>, vector<16x1xf32>,
    %c1_i32 = arith.constant 1 : i32
    %44 = arith.cmpi eq, %arg2, %c1_i32 : i32
    %45 = arith.extui %44 : i1 to i32
    %c0_i32_27 = arith.constant 0 : i32
    %46 = arith.cmpi ne, %45, %c0_i32_27 : i32
    scf.if %46 {
      %c0_28 = arith.constant 0 : index
      %c0_29 = arith.constant 0 : index
      %c0_30 = arith.constant 0 : index
      %47 = vector.load %arg6[%c0_28, %c0_29, %c0_30] : memref<1x16x512xf32, #tpu.memory_space<vmem>>, vector<1x16x512xf32>
      %48 = vector.shape_cast %47 : vector<1x16x512xf32> to vector<16x512xf32>
      %c0_31 = arith.constant 0 : index
      %c0_32 = arith.constant 0 : index
      %49 = vector.load %arg8[%c0_31, %c0_32] : memref<16x1xf32, #tpu.memory_space<vmem>>, vector<16x1xf32>
      %50 = tpu.reciprocal %49 : vector<16x1xf32> -> vector<16x1xf32>
      %51 = vector.broadcast %50 : vector<16x1xf32> to vector<16x512xf32>
      %52 = arith.mulf %48, %51 : vector<16x512xf32>
      %c0_33 = arith.constant 0 : index
      %c0_34 = arith.constant 0 : index
      %c0_35 = arith.constant 0 : index
      %53 = vector.load %arg6[%c0_33, %c0_34, %c0_35] : memref<1x16x512xf32, #tpu.memory_space<vmem>>, vector<1x16x512xf32>
      %54 = vector.shape_cast %53 : vector<1x16x512xf32> to vector<16x512xf32>
      %55 = vector.shape_cast %52 : vector<16x512xf32> to vector<1x16x512xf32>
      tpu.vector_store %arg6[%c0_33, %c0_34, %c0_35], %55 {strides = array<i32>} : memref<1x16x512xf32, #tpu.memory_space<vmem>>, vector<1x16x512xf32>,
    } else {
    }
    return
  }
  func.func @transform_0(%arg0: i32, %arg1: i32, %arg2: i32) -> (i32, i32, i32) {
    %c0_i32 = arith.constant 0 : i32
    %c0_i32_0 = arith.constant 0 : i32
    %c0_i32_1 = arith.constant 0 : i32
    return %c0_i32, %arg1, %c0_i32_0 : i32, i32, i32
  }
  func.func @transform_1(%arg0: i32, %arg1: i32, %arg2: i32) -> (i32, i32, i32) {
    %c0_i32 = arith.constant 0 : i32
    %c0_i32_0 = arith.constant 0 : i32
    return %arg0, %c0_i32, %arg2 : i32, i32, i32
  }
  func.func @transform_2(%arg0: i32, %arg1: i32, %arg2: i32) -> (i32, i32, i32) {
    %c0_i32 = arith.constant 0 : i32
    %c0_i32_0 = arith.constant 0 : i32
    return %arg0, %arg2, %c0_i32 : i32, i32, i32
  }
  func.func @transform_3(%arg0: i32, %arg1: i32, %arg2: i32) -> (i32, i32, i32) {
    %c0_i32 = arith.constant 0 : i32
    %c0_i32_0 = arith.constant 0 : i32
    return %arg0, %arg1, %c0_i32 : i32, i32, i32
  }
}

</mosaic_0001>

<bundles_post_ra>
// kernel: tpu_custom_call.1
= control target key start
LH: loop header
LB: loop body
LE: loop exit
PB: predicated region body
PF: predicated region fallthrough
CT: control target
= control target key end

     0   :  { %s1947_s0 = inlined_call_operand.hbm [shape: bf16[1,16,128], index: 0, kind: input, shape index: {}]   ;;  %s1948_s1 = inlined_call_operand.hbm [shape: bf16[2,128,256], index: 1, kind: input, shape index: {}]   ;;  %s1949_s2 = inlined_call_operand.hbm [shape: bf16[2,256,512], index: 2, kind: input, shape index: {}]   ;;  %s1950_s3 = inlined_call_operand.hbm [shape: f32[2,16,512], index: 3, kind: output, shape index: {}]  }
   0x1   :  { %1961 = sst [smem:[#allocation23_spill]] %s1947_s0 }
   0x2   :  { %1962 = sst [smem:[#allocation24_spill]] %s1948_s1 }
   0x3   :  { %8 = vsyncpa [#allocation5], 0 }
   0x4   :  { %9 = vsyncpa [#allocation8], 0 }
   0x5   :  { %11 = vsyncpa [#allocation8 + $0x1], 0 }
   0x6   :  { %12 = vsyncpa [#allocation6], 0 }
   0x7   :  { %14 = vsyncpa [#allocation6 + $0x1], 0  ;;  %s1578_s12 = smov 0   ;;  %s1580_s13 = smov 0  }
   0x8   :  { %s1582_s14 = smov 0   ;;  %s1584_s15 = smov 0  }
   0x9   :  { %s1586_s16 = smov 0   ;;  %s1588_s17 = smov 0  }
   0xa   :  { %s1590_s18 = smov 0   ;;  %s1592_s19 = smov 0  }
   0xb   :  { %s1594_s20 = smov 0   ;;  %s1596_s21 = smov 0  }
   0xc   :  { %s1598_s22 = smov 0  }
   0xd LB: > { %1963 = sst [smem:[#allocation14_spill]] %s1504_s12  ;;  %s32_s23 = sadd.s32 1, %s1536_s20  ;;  %s1544_s22 = sphi %s1598_s22, %s20_s22   ;;  %s1540_s21 = sphi %s1596_s21, %s1998_s21   ;;  %s1536_s20 = sphi %s1594_s20, %s1997_s20   ;;  %s1532_s19 = sphi %s1592_s19, %s1996_s19   ;;  %s1528_s18 = sphi %s1590_s18, %s1995_s18   ;;  %s1524_s17 = sphi %s1588_s17, %s1988_s17   ;;  %s1520_s16 = sphi %s1586_s16, %s1994_s16   ;;  %s1516_s15 = sphi %s1584_s15, %s1993_s15   ;;  %s1512_s14 = sphi %s1582_s14, %s1986_s14   ;;  %s1508_s13 = sphi %s1580_s13, %s1992_s13   ;;  %s1504_s12 = sphi %s1578_s12, %s1991_s12  }
   0xe   : > { %1964 = sst [smem:[#allocation15_spill]] %s1512_s14  ;;  %s39_s24 = sadd.s32 1, %s1540_s21 }
   0xf   : > { %1965 = sst [smem:[#allocation16_spill]] %s1524_s17  ;;  %p33_p0 = scmp.ge.s32.totalorder %s32_s23, 2 }
  0x10   : > { %1966 = sst [smem:[#allocation17_spill]] %s1544_s22  ;;  %s74_s25 = sadd.s32 1, %s1524_s17 }
  0x11   : > { %p81_p1 = scmp.ne.s32.totalorder %s1524_s17, %s1520_s16  ;;  %p82_p2 = scmp.eq.s32.totalorder %s1544_s22, 0 }
  0x12   : > { %s2000_s23 = smov (%p33_p0, %s32_s23), 0  ;;  %s2002_s24 = smov (!%p33_p0, %s39_s24), %s1540_s21 }
  0x13   : > { %1967 = sst [smem:[#allocation18_spill]] %s2000_s23  ;;  %s70_s26 = ssub.s32 %s1536_s20, %s2000_s23 }
  0x14   : > { %p1644_p3 = por %p82_p2, %p81_p1  ;;  %p41_p4 = scmp.ge.s32.totalorder %s2002_s24, 2 }
  0x15   : > { %p1209_p5 = scmp.lt.s32.totalorder %s1544_s22, 4  ;;  %s184_s28 = sand.u32 1, %s1544_s22  }
  0x16   : > { %s2004_s24 = smov (%p41_p4, %s2002_s24), 0  ;;  %s186_s4 = sand.u32 1, %s1524_s17  }
  0x17   : > { %1969 = sst [smem:[#allocation19_spill]] %s2004_s24  ;;  %s69_s29 = ssub.s32 %s1540_s21, %s2004_s24 }
  0x18   : > { %s71_s30 = sor.u32 %s70_s26, %s69_s29  ;;  %p128_p6 = scmp.eq.s32.totalorder %s69_s29, 0 }
  0x19   : > { %p72_p7 = scmp.eq.s32.totalorder %s71_s30, 0  ;;  %s955_s5 = sshll.u32 %s186_s4, 6 }
  0x1a   : > { %s956_s6 = sshll.u32 %s1540_s21, 5  ;;  %s188_s10 = scalar_lea.vmem [#allocation7], %s955_s5 }
  0x1b   : > { %s1659_s7 = scalar_select %p72_p7, %s1524_s17, %s74_s25  }
  0x1c   : > { %s192_s8 = sadd.s32 %s1536_s20, %s956_s6  ;;  %s197_s11 = sshll.u32 %s188_s10, 4  ;;  %s198_s11 = int_to_ptr.vmem [resolvable:$true] %s197_s11 }
  0x1d   : > { %1970 = sst [smem:[#allocation20_spill]] %s1659_s7  ;;  %s957_s9 = sshll.u32 %s192_s8, 2 }
  0x1e   : > { %s1971_s1 = sld [smem:[#allocation24_spill]]  ;;  %p1669_p8 = pnand %p1209_p5, %p1644_p3 }
  0x1f   : > { %s1673_s5 = scalar_lea.sflag [#allocation8], %s184_s28  ;;  %s1546_s23 = smov 128  }
  0x20   : > { %s1953_s24 = smov 64   ;;  %s1954_s6 = smov 4  }
  0x21   : > { %s1681_s27 = sadd.s32 4294967295, %s1544_s22   ;;  %s951_s8 = sadd.s32 4294967294, %s1544_s22  }
  0x22   : > { %p87_p9 = scmp.ne.s32.totalorder %s1520_s16, %s1516_s15  ;;  %p88_p10 = scmp.eq.s32.totalorder %s1681_s27, 0 }
  0x23   : > { %s130_s28 = sadd.s32 1, %s1512_s14  ;;  %p140_p12 = scmp.ne.s32.totalorder %s1512_s14, %s1508_s13 }
  0x24   : > { %s194_s26 = scalar_lea.hbm %s1971_s1, %s957_s9  ;;  %p1694_p11 = por %p88_p10, %p87_p9 }
  0x25   : > { %s195_s30 = sshll.u32 %s194_s26, 4  ;;  %p141_p13 = scmp.eq.s32.totalorder %s1681_s27, 3  ;;  %s196_s30 = int_to_ptr.hbm [resolvable:$true] %s195_s30 }
  0x26   : > { %1200 = dma.hbm_to_vmem [thread:$0]  (!%p1669_p8), %s196_s30, 1024, %s198_s11, %s1673_s5, %s1546_s23, %s1953_s24, %s1954_s6  }
  0x27   : > { %s1690_s9 = scalar_select %p128_p6, %s1512_s14, %s130_s28  }
  0x28   : > { %p146_p0 = scmp.ne.s32.totalorder %s1508_s13, %s1504_s12  ;;  %p147_p1 = scmp.eq.s32.totalorder %s951_s8, 3 }
  0x29   : > { %1973 = sst [smem:[#allocation21_spill]] %s1690_s9  ;;  %p952_p2 = scmp.ge.s32.totalorder %s1544_s22, 1 }
  0x2a   : > { %p1704_p3 = por %p141_p13, %p140_p12  ;;  %p154_p4 = scmp.lt.s32.totalorder %s1544_s22, 5 }
  0x2b   : > { %p1709_p5 = por %p147_p1, %p146_p0  ;;  %s1979_s0 = sld [smem:[#allocation23_spill]] }
  0x2c   : > { %p1713_p6 = pnand %p952_p2, %p154_p4  ;;  %s1549_s8 = smov [#allocation4]  }
  0x2d   : > { %s1976_s29 = scalar_select %p1709_p5, 1, 0 }
  0x2e   : > { %p1193_p7 = pneg %p1713_p6  ;;  %s170_s28 = sshll.u32 %s1549_s8, 4  ;;  %s171_s28 = int_to_ptr.vmem [resolvable:$true] %s170_s28 }
  0x2f   : > { %1977 = sst [smem:[#allocation22_spill]] %s1976_s29  ;;  %s958_s24 = sshll.u32 %s186_s4, 8 }
  0x30   : > { %p1194_p9 = pnand %p1193_p7, %p88_p10  ;;  %s1140_s6 = sshll.u32 %s1536_s20, 6 }
  0x31   : > { %s168_s23 = sshll.u32 %s1979_s0, 4  ;;  %s961_s1 = sshll.u32 %s1540_s21, 7  ;;  %s169_s23 = int_to_ptr.hbm [resolvable:$true] %s168_s23 }
  0x32   : > { %s217_s7 = sadd.s32 %s1140_s6, %s961_s1  ;;  %s1980_s9 = smov 4  }
  0x33   : > { %s1981_s14 = smov 64   ;;  %s962_s26 = sshll.u32 %s217_s7, 2 }
  0x34   : > { %1196 = dma.hbm_to_vmem [thread:$0]  (!%p1194_p9), %s169_s23, 128, %s171_s28, [#allocation5], %s1981_s14, %s1981_s14, %s1980_s9  }
  0x35   : > { %s211_s30 = scalar_lea.vmem [#allocation9], %s958_s24  ;;  %s219_s8 = scalar_lea.hbm %s1949_s2, %s962_s26 }
  0x36   : > { %s222_s0 = sshll.u32 %s211_s30, 4  ;;  %s220_s17 = sshll.u32 %s219_s8, 4  ;;  %s223_s0 = int_to_ptr.vmem [resolvable:$true] %s222_s0  ;;  %s221_s17 = int_to_ptr.hbm [resolvable:$true] %s220_s17 }
  0x37   : > { %s1550_s4 = smov 256   ;;  %s1551_s22 = smov 16  }
  0x38   : > { %1203 = dma.hbm_to_vmem [thread:$0]  (!%p1669_p8), %s221_s17, 4096, %s223_s0, %s1673_s5, %s1550_s4, %s1550_s4, %s1551_s22  }
  0x39   : > { %234 = sbr.rel (%p1713_p6) target bundleno = 809 (0x329), region = 32 }
  0x3e   : > { %1491 = dma.done.wait (%p88_p10), [#allocation5], 128  }
  0x3f   : > { %1493 = vsyncadd (%p88_p10), [#allocation5], 4294967168  ;;  %s241_s1 = sand.u32 1, %s1681_s27   ;;  %s243_s12 = sand.u32 1, %s1520_s16  }
  0x40   : > { %s965_s14 = sshll.u32 %s243_s12, 6  ;;  %s242_s7 = scalar_lea.sflag [#allocation8], %s241_s1 }
  0x41   : > { %s1745_s24 = scalar_lea.vmem [#allocation7], %s965_s14 }
  0x42   : > { %1495 = dma.done.wait (%p1694_p11), %s242_s7, 5120  }
  0x43   : > { %1497 = vsyncadd (%p1694_p11), %s242_s7, 4294962176  ;;  %s966_s0 = sshll.u32 %s243_s12, 8  ;;  %s281_s17 = sand.u32 1, %s1508_s13  }
  0x44   : > { %s967_s22 = sshll.u32 %s281_s17, 6  ;;  %s1754_s25 = scalar_lea.vmem [#allocation9], %s966_s0 }
  0x45   : > { %s1756_s5 = scalar_lea.vmem [#allocation10], %s967_s22  ;;  %p968_p8 = scmp.ne.s32.totalorder %s1528_s18, 0 }
  0x47   : > { %290 = sbr.rel (%p968_p8) target bundleno = 89 (0x59), region = 48 }
  0x4c   : > { %vm291_vm0 = vcmask 7168   ;;  %v1552_v0 = vmov -inf   ;;  %v1553_v1 = vmov 0.0  }
  0x4d   : > { %292 = vst.msk [vmem:[#allocation2] sm:$0xff] %vm291_vm0, %v1552_v0 }
  0x4e   : > { %293 = vst.msk [vmem:[#allocation2 + $0x8] sm:$0xff] %vm291_vm0, %v1552_v0 }
  0x4f   : > { %294 = vst.msk [vmem:[#allocation3] sm:$0xff] %vm291_vm0, %v1553_v1 }
  0x50   : > { %295 = vst.msk [vmem:[#allocation3 + $0x8] sm:$0xff] %vm291_vm0, %v1553_v1 }
  0x51   : > { %296 = vst [vmem:[%s1756_s5] sm:$0xff] %v1553_v1 }
  0x52   : > { %297 = vst [vmem:[%s1756_s5 + $0x8] sm:$0xff] %v1553_v1 }
  0x53   : > { %298 = vst [vmem:[%s1756_s5 + $0x10] sm:$0xff] %v1553_v1 }
  0x54   : > { %299 = vst [vmem:[%s1756_s5 + $0x18] sm:$0xff] %v1553_v1 }
  0x55   : > { %300 = vst [vmem:[%s1756_s5 + $0x20] sm:$0xff] %v1553_v1 }
  0x56   : > { %301 = vst [vmem:[%s1756_s5 + $0x28] sm:$0xff] %v1553_v1 }
  0x57   : > { %302 = vst [vmem:[%s1756_s5 + $0x30] sm:$0xff] %v1553_v1 }
  0x58   : > { %303 = vst [vmem:[%s1756_s5 + $0x38] sm:$0xff] %v1553_v1 }
  0x59 PF: > { %v1149_v2 = vld [vmem:[%s1745_s24 + $0x38] sm:$0xff]  ;;  %v1148_v3 = vld [vmem:[%s1745_s24 + $0x30] sm:$0xff]  ;;  %v1147_v4 = vld [vmem:[%s1745_s24 + $0x28] sm:$0xff]  ;;  %v423_v11 = vlaneseq  ;;  %s1005_s6 = sshll.u32 %s1528_s18, 7  ;;  %v1554_v19 = vmov 0   ;;  %vm470_vm2 = vcmask 7168  }
  0x5a   : > { %408 = vmatpush.bf16.msra.mxu0 %v1149_v2  ;;  %v1146_v5 = vld [vmem:[%s1745_s24 + $0x20] sm:$0xff]  ;;  %v1145_v6 = vld [vmem:[%s1745_s24 + $0x18] sm:$0xff]  ;;  %v1144_v7 = vld [vmem:[%s1745_s24 + $0x10] sm:$0xff]  ;;  %v425_v13 = vstv %s1005_s6  ;;  %1312 = vset.pattern.permute.xlu1 %v1554_v19  ;;  %p1134_p10 = scmp.ne.s32.totalorder %s1528_s18, 1 }
  0x5b   : > { %v1143_v8 = vld [vmem:[%s1745_s24 + $0x8] sm:$0xff]  ;;  %v1142_v9 = vld [vmem:[%s1745_s24] sm:$0xff]  ;;  %v1141_v10 = vld [vmem:[#allocation4] sm:$0xff]  ;;  %v424_v12 = vand.u32 127, %v423_v11  ;;  %1313 = vset.pattern.permute.xlu2 %v1554_v19  ;;  %1314 = vset.pattern.permute.xlu0 %v1554_v19 }
  0x5c   : > { %v430_v20 = vld [vmem:[#allocation2] sm:$0xff]  ;;  %v431_v25 = vld [vmem:[#allocation2 + $0x8] sm:$0xff]  ;;  %v1180_v33 = vld [vmem:[%s1754_s25 + $0xec] sm:$0xf0] }
  0x5d   : > { %v426_v14 = vadd.s32 %v425_v13, %v424_v12  ;;  %v1120_v32 = vld [vmem:[%s1754_s25 + $0xe0] sm:$0xf]  ;;  %v1178_v34 = vld [vmem:[%s1754_s25 + $0xe4] sm:$0xf]  ;;  %v1122_v36 = vld [vmem:[%s1754_s25 + $0xf0] sm:$0xf0] }
  0x5e   : > { %409 = vmatpush.bf16.msra.mxu0 %v1148_v3  ;;  %v1121_v35 = vor.u32 %v1180_v33, %v1120_v32  ;;  %v1128_v37 = vld [vmem:[%s1754_s25 + $0xe8] sm:$0xf]  ;;  %v1181_v38 = vld [vmem:[%s1754_s25 + $0xf4] sm:$0xf0]  ;;  %v1125_v39 = vor.u32 %v1178_v34, %v1122_v36  ;;  %v1179_v41 = vld [vmem:[%s1754_s25 + $0xec] sm:$0xf] }
  0x5f   : > { %vm427_vm1 = vcmp.lt.s32.totalorder %v426_v14, 160  ;;  %v1129_v40 = vor.u32 %v1181_v38, %v1128_v37  ;;  %v1130_v42 = vld [vmem:[%s1754_s25 + $0xf8] sm:$0xf0]  ;;  %v1104_v43 = vld [vmem:[%s1754_s25 + $0xc0] sm:$0xf] }
  0x60   : > { %634 = vmatpush.bf16.msra.mxu1 %v1121_v35  ;;  %v1133_v44 = vor.u32 %v1179_v41, %v1130_v42  ;;  %v1176_v45 = vld [vmem:[%s1754_s25 + $0xcc] sm:$0xf0]  ;;  %v1174_v46 = vld [vmem:[%s1754_s25 + $0xc4] sm:$0xf]  ;;  %v1106_v47 = vld [vmem:[%s1754_s25 + $0xd0] sm:$0xf0]  ;;  %648 = vmatpush.bf16.msra.mxu2 %v1125_v39 }
  0x61   : > { %662 = vmatpush.bf16.msra.mxu3 %v1129_v40  ;;  %v1105_v48 = vor.u32 %v1176_v45, %v1104_v43  ;;  %v1109_v49 = vor.u32 %v1174_v46, %v1106_v47  ;;  %v1112_v50 = vld [vmem:[%s1754_s25 + $0xc8] sm:$0xf]  ;;  %v1177_v51 = vld [vmem:[%s1754_s25 + $0xd4] sm:$0xf0]  ;;  %v1175_v52 = vld [vmem:[%s1754_s25 + $0xcc] sm:$0xf] }
  0x62   : > { %410 = vmatpush.bf16.msra.mxu0 %v1147_v4  ;;  %v1113_v53 = vor.u32 %v1177_v51, %v1112_v50  ;;  %v1114_v54 = vld [vmem:[%s1754_s25 + $0xd8] sm:$0xf0]  ;;  %v1088_v56 = vld [vmem:[%s1754_s25 + $0xa0] sm:$0xf]  ;;  %v1172_v57 = vld [vmem:[%s1754_s25 + $0xac] sm:$0xf0] }
  0x63   : > { %v1117_v55 = vor.u32 %v1175_v52, %v1114_v54  ;;  %v1170_v58 = vld [vmem:[%s1754_s25 + $0xa4] sm:$0xf]  ;;  %v1089_v59 = vor.u32 %v1172_v57, %v1088_v56  ;;  %v1090_v60 = vld [vmem:[%s1754_s25 + $0xb0] sm:$0xf0]  ;;  %v1096_v61 = vld [vmem:[%s1754_s25 + $0xa8] sm:$0xf] }
  0x64   : > { %635 = vmatpush.bf16.msra.mxu1 %v1105_v48  ;;  %649 = vmatpush.bf16.msra.mxu2 %v1109_v49  ;;  %v1173_v62 = vld [vmem:[%s1754_s25 + $0xb4] sm:$0xf0]  ;;  %v1093_v63 = vor.u32 %v1170_v58, %v1090_v60  ;;  %v1171_v1 = vld [vmem:[%s1754_s25 + $0xac] sm:$0xf]  ;;  %v1098_v2 = vld [vmem:[%s1754_s25 + $0xb8] sm:$0xf0] }
  0x65   : > { %663 = vmatpush.bf16.msra.mxu3 %v1113_v53  ;;  %v1097_v0 = vor.u32 %v1173_v62, %v1096_v61  ;;  %v1101_v3 = vor.u32 %v1171_v1, %v1098_v2  ;;  %v1072_v4 = vld [vmem:[%s1754_s25 + $0x80] sm:$0xf]  ;;  %v1167_v13 = vld [vmem:[%s1754_s25 + $0x8c] sm:$0xf]  ;;  %v1082_v14 = vld [vmem:[%s1754_s25 + $0x98] sm:$0xf0] }
  0x66   : > { %411 = vmatpush.bf16.msra.mxu0 %v1146_v5  ;;  %v1168_v5 = vld [vmem:[%s1754_s25 + $0x8c] sm:$0xf0]  ;;  %v1040_v32 = vld [vmem:[%s1754_s25 + $0x40] sm:$0xf]  ;;  %v1158_v34 = vld [vmem:[%s1754_s25 + $0x44] sm:$0xf] }
  0x67   : > { %v1164_v19 = vld [vmem:[%s1754_s25 + $0x6c] sm:$0xf0]  ;;  %v1042_v36 = vld [vmem:[%s1754_s25 + $0x50] sm:$0xf0]  ;;  %v1048_v37 = vld [vmem:[%s1754_s25 + $0x48] sm:$0xf] }
  0x68   : > { %636 = vmatpush.bf16.msra.mxu1 %v1089_v59  ;;  %650 = vmatpush.bf16.msra.mxu2 %v1093_v63  ;;  %v1160_v33 = vld [vmem:[%s1754_s25 + $0x4c] sm:$0xf0]  ;;  %v1161_v38 = vld [vmem:[%s1754_s25 + $0x54] sm:$0xf0]  ;;  %v1045_v39 = vor.u32 %v1158_v34, %v1042_v36  ;;  %v1159_v41 = vld [vmem:[%s1754_s25 + $0x4c] sm:$0xf] }
  0x69   : > { %664 = vmatpush.bf16.msra.mxu3 %v1097_v0  ;;  %v1041_v35 = vor.u32 %v1160_v33, %v1040_v32  ;;  %v1049_v40 = vor.u32 %v1161_v38, %v1048_v37  ;;  %v1050_v42 = vld [vmem:[%s1754_s25 + $0x58] sm:$0xf0]  ;;  %v1156_v45 = vld [vmem:[%s1754_s25 + $0x2c] sm:$0xf0]  ;;  %v1154_v46 = vld [vmem:[%s1754_s25 + $0x24] sm:$0xf] }
  0x6a   : > { %412 = vmatpush.bf16.msra.mxu0 %v1145_v6  ;;  %v1166_v6 = vld [vmem:[%s1754_s25 + $0x84] sm:$0xf]  ;;  %v1053_v43 = vor.u32 %v1159_v41, %v1050_v42  ;;  %v1026_v48 = vld [vmem:[%s1754_s25 + $0x30] sm:$0xf0]  ;;  %v1032_v49 = vld [vmem:[%s1754_s25 + $0x28] sm:$0xf] }
  0x6b   : > { %v1157_v50 = vld [vmem:[%s1754_s25 + $0x34] sm:$0xf0]  ;;  %v1029_v51 = vor.u32 %v1154_v46, %v1026_v48  ;;  %v1155_v53 = vld [vmem:[%s1754_s25 + $0x2c] sm:$0xf]  ;;  %v1034_v54 = vld [vmem:[%s1754_s25 + $0x38] sm:$0xf0] }
  0x6c   : > { %v1033_v52 = vor.u32 %v1157_v50, %v1032_v49  ;;  %v1037_v56 = vor.u32 %v1155_v53, %v1034_v54  ;;  %v1152_v57 = vld [vmem:[%s1754_s25 + $0xc] sm:$0xf0]  ;;  %v1150_v58 = vld [vmem:[%s1754_s25 + $0x4] sm:$0xf]  ;;  %v1010_v59 = vld [vmem:[%s1754_s25 + $0x10] sm:$0xf0] }
  0x6d   : > { %v1013_v61 = vor.u32 %v1150_v58, %v1010_v59  ;;  %v1016_v62 = vld [vmem:[%s1754_s25 + $0x8] sm:$0xf]  ;;  %v1153_v63 = vld [vmem:[%s1754_s25 + $0x14] sm:$0xf0]  ;;  %v1151_v0 = vld [vmem:[%s1754_s25 + $0xc] sm:$0xf] }
  0x6e   : > { %413 = vmatpush.bf16.msra.mxu0 %v1144_v7  ;;  %v1073_v7 = vor.u32 %v1168_v5, %v1072_v4  ;;  %v1017_v1 = vor.u32 %v1153_v63, %v1016_v62  ;;  %v1018_v2 = vld [vmem:[%s1754_s25 + $0x18] sm:$0xf0]  ;;  %v694_v33 = vld [vmem:[%s1756_s5 + $0x20] sm:$0xff]  ;;  %v696_v48 = vld [vmem:[%s1756_s5 + $0x30] sm:$0xff] }
  0x70   : > { %637 = vmatpush.bf16.msra.mxu1 %v1073_v7 }
  0x72   : > { %414 = vmatpush.bf16.msra.mxu0 %v1143_v8  ;;  %v1074_v8 = vld [vmem:[%s1754_s25 + $0x90] sm:$0xf0] }
  0x73   : > { %v1077_v11 = vor.u32 %v1166_v6, %v1074_v8 }
  0x75   : > { %651 = vmatpush.bf16.msra.mxu2 %v1077_v11 }
  0x76   : > { %415 = vmatpush.bf16.msra.mxu0 %v1142_v9  ;;  %v1080_v9 = vld [vmem:[%s1754_s25 + $0x88] sm:$0xf] }
  0x79   : > { %416 = vmatmul.bf16.vlgmr.msra.gmra.mxu0 %v1141_v10  ;;  %v1169_v10 = vld [vmem:[%s1754_s25 + $0x94] sm:$0xf0] }
  0x7a   : > { %676 = vmatpush.bf16.msrb.mxu0 %v1133_v44  ;;  %v1081_v12 = vor.u32 %v1169_v10, %v1080_v9  ;;  %v1024_v44 = vld [vmem:[%s1754_s25 + $0x20] sm:$0xf] }
  0x7b   : > { %v1025_v47 = vor.u32 %v1156_v45, %v1024_v44 }
  0x7c   : > { %665 = vmatpush.bf16.msra.mxu3 %v1081_v12 }
  0x7e   : > { %677 = vmatpush.bf16.msrb.mxu0 %v1117_v55  ;;  %v1008_v55 = vld [vmem:[%s1754_s25] sm:$0xf] }
  0x7f   : > { %v1009_v60 = vor.u32 %v1152_v57, %v1008_v55 }
  0x82   : > { %678 = vmatpush.bf16.msrb.mxu0 %v1101_v3  ;;  %v1021_v3 = vor.u32 %v1151_v0, %v1018_v2 }
  0xf6   : > { %v417_v15 = vpop.f32.mrf.mxu0 }
  0xf7   : > { %v1776_v16 = vsel %vm427_vm1, %v417_v15, -inf  ;;  %v1085_v15 = vor.u32 %v1167_v13, %v1082_v14  ;;  %v460_v13 = vld [vmem:[#allocation3] sm:$0xff] }
  0xf8   : > { %432 = vmax.xlane.f32.xlu0 %v1776_v16 }
  0xf9   : > { %679 = vmatpush.bf16.msrb.mxu0 %v1085_v15 }
  0xfe   : > { %v419_v17 = vpop.f32.mrf.mxu0 }
  0xff   : > { %v1779_v18 = vsel %vm427_vm1, %v419_v17, -inf  ;;  %v1056_v17 = vld [vmem:[%s1754_s25 + $0x60] sm:$0xf] }
 0x100   : > { %434 = vmax.xlane.f32.xlu0 %v1779_v18 }
 0x16b   : > { %v433_v21 = vpop.xlane.xlu0 %432 }
 0x16c   : > { %v436_v22 = vmax.f32 %v430_v20, %v433_v21  ;;  %v1057_v21 = vor.u32 %v1164_v19, %v1056_v17 }
 0x16e   : > { %v438_v23 = vsub.f32 %v430_v20, %v436_v22  ;;  %732 = vst.msk [vmem:[#allocation2] sm:$0xff] %vm470_vm2, %v436_v22  ;;  %446 = vperm.xlu1 %1312, %v436_v22   ;;  %v1162_v20 = vld [vmem:[%s1754_s25 + $0x64] sm:$0xf]  ;;  %v1058_v22 = vld [vmem:[%s1754_s25 + $0x70] sm:$0xf0]  ;;  %638 = vmatpush.bf16.msra.mxu1 %v1057_v21 }
 0x170   : > { %v440_v24 = vmul.f32 1.442695, %v438_v23  ;;  %v1064_v23 = vld [vmem:[%s1754_s25 + $0x68] sm:$0xf] }
 0x172   : > { %1315 = vpow2.f32 %v440_v24  ;;  %v1165_v24 = vld [vmem:[%s1754_s25 + $0x74] sm:$0xf0]  ;;  %639 = vmatpush.bf16.msra.mxu1 %v1041_v35 }
 0x173   : > { %v435_v26 = vpop.xlane.xlu0 %434  ;;  %v697_v35 = vld [vmem:[%s1756_s5 + $0x38] sm:$0xff] }
 0x174   : > { %v437_v27 = vmax.f32 %v431_v25, %v435_v26  ;;  %v1065_v26 = vor.u32 %v1165_v24, %v1064_v23 }
 0x176   : > { %v439_v28 = vsub.f32 %v431_v25, %v437_v27  ;;  %733 = vst.msk [vmem:[#allocation2 + $0x8] sm:$0xff] %vm470_vm2, %v437_v27  ;;  %451 = vperm.xlu1 %1312, %v437_v27   ;;  %v1061_v25 = vor.u32 %v1162_v20, %v1058_v22  ;;  %v1163_v27 = vld [vmem:[%s1754_s25 + $0x6c] sm:$0xf]  ;;  %666 = vmatpush.bf16.msra.mxu3 %v1065_v26  ;;  %v690_v22 = vld [vmem:[%s1756_s5] sm:$0xff] }
 0x177   : > { %640 = vmatpush.bf16.msra.mxu1 %v1025_v47  ;;  %v695_v47 = vld [vmem:[%s1756_s5 + $0x28] sm:$0xff] }
 0x178   : > { %v1784_v29 = vpop.eup %1315  ;;  %v442_v30 = vmul.f32 1.442695, %v439_v28  ;;  %v1066_v28 = vld [vmem:[%s1754_s25 + $0x78] sm:$0xf0]  ;;  %652 = vmatpush.bf16.msra.mxu2 %v1061_v25 }
 0x179   : > { %700 = vperm.xlu2 %1313, %v1784_v29  }
 0x17a   : > { %1317 = vpow2.f32 %v442_v30  ;;  %v1069_v30 = vor.u32 %v1163_v27, %v1066_v28  ;;  %667 = vmatpush.bf16.msra.mxu3 %v1049_v40 }
 0x17b   : > { %641 = vmatpush.bf16.msra.mxu1 %v1009_v60 }
 0x17c   : > { %680 = vmatpush.bf16.msrb.mxu0 %v1069_v30  ;;  %653 = vmatpush.bf16.msra.mxu2 %v1045_v39  ;;  %v691_v30 = vld [vmem:[%s1756_s5 + $0x8] sm:$0xff] }
 0x17e   : > { %668 = vmatpush.bf16.msra.mxu3 %v1033_v52 }
 0x180   : > { %v1787_v31 = vpop.eup %1317  ;;  %681 = vmatpush.bf16.msrb.mxu0 %v1053_v43  ;;  %654 = vmatpush.bf16.msra.mxu2 %v1029_v51 }
 0x181   : > { %705 = vperm.xlu2 %1313, %v1787_v31  }
 0x182   : > { %669 = vmatpush.bf16.msra.mxu3 %v1017_v1 }
 0x184   : > { %682 = vmatpush.bf16.msrb.mxu0 %v1037_v56  ;;  %655 = vmatpush.bf16.msra.mxu2 %v1013_v61 }
 0x188   : > { %683 = vmatpush.bf16.msrb.mxu0 %v1021_v3 }
 0x1d3   : > { %v701_v21 = vpop.permute.xlu2 %700 }
 0x1d4   : > { %v708_v23 = vmul.f32 %v701_v21, %v690_v22  ;;  %v709_v34 = vmul.f32 %v701_v21, %v691_v30 }
 0x1db   : > { %v706_v32 = vpop.permute.xlu2 %705 }
 0x1dc   : > { %v712_v40 = vmul.f32 %v706_v32, %v694_v33  ;;  %v715_v43 = vmul.f32 %v706_v32, %v697_v35  ;;  %v713_v49 = vmul.f32 %v706_v32, %v695_v47  ;;  %v714_v51 = vmul.f32 %v706_v32, %v696_v48 }
 0x1e0   : > { %v447_v4 = vpop.permute.xlu1 %446 }
 0x1e1   : > { %v454_v5 = vsub.f32 %v1776_v16, %v447_v4  ;;  %v462_v16 = vmul.f32 %v1784_v29, %v460_v13  ;;  %v693_v29 = vld [vmem:[%s1756_s5 + $0x18] sm:$0xff] }
 0x1e2   : > { %v711_v25 = vmul.f32 %v701_v21, %v693_v29 }
 0x1e3   : > { %v456_v6 = vmul.f32 1.442695, %v454_v5 }
 0x1e5   : > { %1319 = vpow2.f32 %v456_v6 }
 0x1e8   : > { %v452_v7 = vpop.permute.xlu1 %451 }
 0x1e9   : > { %v455_v8 = vsub.f32 %v1779_v18, %v452_v7  ;;  %v461_v18 = vld [vmem:[#allocation3 + $0x8] sm:$0xff] }
 0x1ea   : > { %v463_v17 = vmul.f32 %v1787_v31, %v461_v18  ;;  %v692_v31 = vld [vmem:[%s1756_s5 + $0x10] sm:$0xff] }
 0x1eb   : > { %v1320_v9 = vpop.eup %1319  ;;  %v458_v10 = vmul.f32 1.442695, %v455_v8  ;;  %v710_v37 = vmul.f32 %v701_v21, %v692_v31 }
 0x1ec   : > { %464 = vadd.xlane.f32.xlu0 %v1320_v9 }
 0x1ed   : > { %1321 = vpow2.f32 %v458_v10 }
 0x1f3   : > { %v1322_v11 = vpop.eup %1321 }
 0x1f4   : > { %466 = vadd.xlane.f32.xlu1 %v1322_v11  ;;  %v473_v12 = vpack.c.bf16 %v1322_v11, %v1320_v9 }
 0x1f6   : > { %642 = vmatmul.bf16.vlgmr.msra.gmra.mxu1 %v473_v12  ;;  %656 = vmatmul.bf16.vlgmr.msra.gmra.mxu2 %v473_v12 }
 0x1f7   : > { %670 = vmatmul.bf16.vlgmr.msra.gmra.mxu3 %v473_v12  ;;  %684 = vmatmul.bf16.vlgmr.msrb.gmra.mxu0 %v473_v12 }
 0x25f   : > { %v465_v14 = vpop.xlane.xlu0 %464 }
 0x260   : > { %v468_v15 = vadd.f32 %v465_v14, %v462_v16 }
 0x262   : > { %471 = vst.msk [vmem:[#allocation3] sm:$0xff] %vm470_vm2, %v468_v15 }
 0x267   : > { %v467_v19 = vpop.xlane.xlu1 %466 }
 0x268   : > { %v469_v20 = vadd.f32 %v467_v19, %v463_v17 }
 0x26a   : > { %472 = vst.msk [vmem:[#allocation3 + $0x8] sm:$0xff] %vm470_vm2, %v469_v20 }
 0x273   : > { %v643_v24 = vpop.f32.mrf.mxu1 }
 0x274   : > { %v716_v26 = vadd.f32 %v708_v23, %v643_v24  ;;  %v685_v27 = vpop.f32.mrf.mxu0 }
 0x275   : > { %v719_v28 = vadd.f32 %v711_v25, %v685_v27 }
 0x276   : > { %724 = vst [vmem:[%s1756_s5] sm:$0xff] %v716_v26 }
 0x277   : > { %727 = vst [vmem:[%s1756_s5 + $0x18] sm:$0xff] %v719_v28 }
 0x279   : > { %v657_v36 = vpop.f32.mrf.mxu2 }
 0x27a   : > { %v717_v38 = vadd.f32 %v709_v34, %v657_v36  ;;  %v671_v39 = vpop.f32.mrf.mxu3 }
 0x27b   : > { %v718_v41 = vadd.f32 %v710_v37, %v671_v39  ;;  %v645_v42 = vpop.f32.mrf.mxu1 }
 0x27c   : > { %725 = vst [vmem:[%s1756_s5 + $0x8] sm:$0xff] %v717_v38  ;;  %v720_v44 = vadd.f32 %v712_v40, %v645_v42  ;;  %v687_v45 = vpop.f32.mrf.mxu0 }
 0x27d   : > { %726 = vst [vmem:[%s1756_s5 + $0x10] sm:$0xff] %v718_v41  ;;  %v723_v46 = vadd.f32 %v715_v43, %v687_v45 }
 0x27e   : > { %728 = vst [vmem:[%s1756_s5 + $0x20] sm:$0xff] %v720_v44 }
 0x27f   : > { %731 = vst [vmem:[%s1756_s5 + $0x38] sm:$0xff] %v723_v46 }
 0x281   : > { %v659_v50 = vpop.f32.mrf.mxu2  ;;  %737 = sbr.rel (%p1134_p10) target bundleno = 793 (0x319), region = 52 }
 0x282   : > { %v721_v52 = vadd.f32 %v713_v49, %v659_v50  ;;  %v673_v53 = vpop.f32.mrf.mxu3 }
 0x283   : > { %v722_v54 = vadd.f32 %v714_v51, %v673_v53 }
 0x284   : > { %729 = vst [vmem:[%s1756_s5 + $0x28] sm:$0xff] %v721_v52 }
 0x285   : > { %730 = vst [vmem:[%s1756_s5 + $0x30] sm:$0xff] %v722_v54 }
 0x286   : > { %v746_v55 = vld [vmem:[#allocation3] sm:$0xff]  ;;  %v747_v56 = vld [vmem:[#allocation3 + $0x8] sm:$0xff]  ;;  %v1555_v57 = vmov 0   ;;  %v738_v16 = vld [vmem:[%s1756_s5] sm:$0xff] }
 0x287   : > { %1323 = vset.pattern.permute.xlu0 %v1555_v57  ;;  %1324 = vrcp.f32 %v746_v55  ;;  %v759_v61 = vand.u32 2147483648, %v746_v55  ;;  %vm753_vm3 = vweird.f32 %v746_v55  ;;  %v757_v0 = vand.u32 2147483647, %v746_v55  ;;  %v739_v14 = vld [vmem:[%s1756_s5 + $0x8] sm:$0xff]  ;;  %v740_v15 = vld [vmem:[%s1756_s5 + $0x10] sm:$0xff]  ;;  %v741_v18 = vld [vmem:[%s1756_s5 + $0x18] sm:$0xff] }
 0x288   : > { %1326 = vrcp.f32 %v747_v56  ;;  %vm767_vm7 = vweird.f32 %v747_v56  ;;  %v773_v6 = vand.u32 2147483648, %v747_v56  ;;  %v771_v9 = vand.u32 2147483647, %v747_v56  ;;  %v742_v29 = vld [vmem:[%s1756_s5 + $0x20] sm:$0xff]  ;;  %v745_v25 = vld [vmem:[%s1756_s5 + $0x38] sm:$0xff] }
 0x289   : > { %v760_v3 = vor.u32 1.1754944e-38, %v759_v61  ;;  %vm758_vm6 = vcmp.eq.f32.partialorder %v757_v0, 8.507059e+37 }
 0x28a   : > { %v774_v11 = vor.u32 1.1754944e-38, %v773_v6  ;;  %vm772_vm10 = vcmp.eq.f32.partialorder %v771_v9, 8.507059e+37 }
 0x28b   : > { %v743_v23 = vld [vmem:[%s1756_s5 + $0x28] sm:$0xff] }
 0x28c   : > { %v744_v24 = vld [vmem:[%s1756_s5 + $0x30] sm:$0xff] }
 0x28d   : > { %v1325_v58 = vpop.eup %1324 }
 0x28e   : > { %v1327_v59 = vpop.eup %1326  ;;  %v749_v60 = vmul.f32 %v1325_v58, %v746_v55  ;;  %vm754_vm4 = vweird.f32 %v1325_v58 }
 0x28f   : > { %v763_v62 = vmul.f32 %v1327_v59, %v747_v56  ;;  %vm755_vm5 = vmor %vm753_vm3, %vm754_vm4  ;;  %vm768_vm8 = vweird.f32 %v1327_v59 }
 0x290   : > { %v750_v63 = vsub.f32 1.0, %v749_v60  ;;  %vm769_vm9 = vmor %vm767_vm7, %vm768_vm8 }
 0x291   : > { %v764_v1 = vsub.f32 1.0, %v763_v62 }
 0x292   : > { %v751_v2 = vmul.f32 %v1325_v58, %v750_v63 }
 0x293   : > { %v765_v4 = vmul.f32 %v1327_v59, %v764_v1 }
 0x294   : > { %v752_v5 = vadd.f32 %v1325_v58, %v751_v2 }
 0x295   : > { %v766_v8 = vadd.f32 %v1327_v59, %v765_v4 }
 0x296   : > { %v756_v7 = vsel %vm755_vm5, %v1325_v58, %v752_v5 }
 0x297   : > { %v761_v10 = vsel %vm758_vm6, %v760_v3, %v756_v7  ;;  %v770_v12 = vsel %vm769_vm9, %v1327_v59, %v766_v8 }
 0x298   : > { %778 = vperm.xlu0 %1323, %v761_v10   ;;  %v775_v13 = vsel %vm772_vm10, %v774_v11, %v770_v12 }
 0x2a0   : > { %783 = vperm.xlu0 %1323, %v775_v13  }
 0x30a   : > { %v779_v17 = vpop.permute.xlu0 %778 }
 0x30b   : > { %v786_v19 = vmul.f32 %v779_v17, %v738_v16  ;;  %v787_v20 = vmul.f32 %v779_v17, %v739_v14  ;;  %v788_v21 = vmul.f32 %v779_v17, %v740_v15  ;;  %v789_v22 = vmul.f32 %v779_v17, %v741_v18 }
 0x30d   : > { %794 = vst [vmem:[%s1756_s5] sm:$0xff] %v786_v19 }
 0x30e   : > { %795 = vst [vmem:[%s1756_s5 + $0x8] sm:$0xff] %v787_v20 }
 0x30f   : > { %796 = vst [vmem:[%s1756_s5 + $0x10] sm:$0xff] %v788_v21 }
 0x310   : > { %797 = vst [vmem:[%s1756_s5 + $0x18] sm:$0xff] %v789_v22 }
 0x312   : > { %v784_v26 = vpop.permute.xlu0 %783 }
 0x313   : > { %v790_v27 = vmul.f32 %v784_v26, %v742_v29  ;;  %v791_v28 = vmul.f32 %v784_v26, %v743_v23  ;;  %v792_v30 = vmul.f32 %v784_v26, %v744_v24  ;;  %v793_v31 = vmul.f32 %v784_v26, %v745_v25 }
 0x315   : > { %798 = vst [vmem:[%s1756_s5 + $0x20] sm:$0xff] %v790_v27 }
 0x316   : > { %799 = vst [vmem:[%s1756_s5 + $0x28] sm:$0xff] %v791_v28 }
 0x317   : > { %800 = vst [vmem:[%s1756_s5 + $0x30] sm:$0xff] %v792_v30 }
 0x318   : > { %801 = vst [vmem:[%s1756_s5 + $0x38] sm:$0xff] %v793_v31 }
 0x319 PF: > { %s1182_s18 = sshll.u32 %s1532_s19, 6  ;;  %s818_s29 = sshll.u32 %s1756_s5, 4  ;;  %s819_s29 = int_to_ptr.vmem [resolvable:$true] %s818_s29 }
 0x31a   : > { %s817_s10 = scalar_lea.hbm %s1950_s3, %s1182_s18  ;;  %s803_s23 = scalar_lea.sflag [#allocation6], %s281_s17 }
 0x31b   : > { %s820_s11 = sshll.u32 %s817_s10, 4  ;;  %s1438_s19 = scalar_lea.hbm %s1950_s3, 128  ;;  %s821_s11 = int_to_ptr.hbm [resolvable:$true] %s820_s11 }
 0x31c   : > { %s1432_s28 = sshra.s32 %s821_s11, 4  ;;  %s1433_s28 = int_to_ptr.hbm [resolvable:$true] %s1432_s28 }
 0x31d   : > { %s1434_s26 = scalar_lea.hbm %s1433_s28, 64  ;;  %p1439_p0 = scmp.lt.s32.totalorder %s1433_s28, %s1950_s3 }
 0x31e   : > { %p1435_p11 = scmp.ne.s32.totalorder %s1433_s28, %s1434_s26  ;;  %p1440_p1 = scmp.lt.s32.totalorder %s1438_s19, %s1434_s26 }
 0x320   : > { %p1436_p12 = pnand %p1435_p11, %p1704_p3  ;;  %p1441_p2 = por %p1440_p1, %p1439_p0 }
 0x322   : > { %p1437_p13 = pneg %p1436_p12 }
 0x324   : > { %p1442_p4 = pnand %p1441_p2, %p1437_p13 }
 0x326   : > { %1445 = shalt.err (!%p1442_p4)
}
 0x327   : > { %s1556_s12 = smov 512   ;;  %s1557_s14 = smov 32  }
 0x328   : > { %1191 = dma.vmem_to_hbm [thread:$0]  (%p1704_p3), %s819_s29, 1024, %s821_s11, %s803_s23, %s1556_s12, %s1556_s12, %s1557_s14  }
 0x329 PF: > { %s1982_s7 = sld [smem:[#allocation17_spill]] }
 0x32a   : > { %s1983_s24 = sld [smem:[#allocation14_spill]] }
 0x32f   : > { %p1211_p6 = scmp.ge.s32.totalorder %s1982_s7, 2 }
 0x330   : > { %s835_s17 = sand.u32 1, %s1983_s24  }
 0x331   : > { %p1205_p7 = pnand %p1211_p6, %p1709_p5  ;;  %s836_s22 = scalar_lea.sflag [#allocation6], %s835_s17 }
 0x333   : > { %p1206_p9 = pneg %p1205_p7 }
 0x335   : > { %1499 = dma.done.wait (%p1206_p9), %s836_s22, 1024  }
 0x336   : > { %1501 = vsyncadd (%p1206_p9), %s836_s22, 4294966272  ;;  %s20_s22 = sadd.s32 1, %s1982_s7   ;;  %s1985_s25 = sld [smem:[#allocation15_spill]] }
 0x337   : > { %p17_p8 = scmp.ge.s32.totalorder %s20_s22, 6   ;;  %s1986_s14 = sld [smem:[#allocation21_spill]] }
 0x338   : > { %s1987_s5 = sld [smem:[#allocation16_spill]]  ;;  %s1991_s12 = smov %s1508_s13 }
 0x339   : > { %s1988_s17 = sld [smem:[#allocation20_spill]]  ;;  %s1993_s15 = smov %s1520_s16 }
 0x33a   : > { %s1989_s6 = sld [smem:[#allocation18_spill]]  ;;  %s1995_s18 = smov %s1536_s20 }
 0x33b   : > { %s1990_s27 = sld [smem:[#allocation19_spill]]  ;;  %s1996_s19 = smov %s1540_s21 }
 0x33c   : > { %s1992_s13 = smov %s1985_s25 }
 0x33d   :  { %19 = sbr.rel (!%p17_p8) target bundleno = 13 (0xd), region = 102 }
 0x33e   : > { %s1994_s16 = smov %s1987_s5 }
 0x340   : > { %s1997_s20 = smov %s1989_s6 }
 0x341   : > { %s1998_s21 = smov %s1990_s27 }
 0x342   :  { %842 = vsyncpa [#allocation5], 1 }
 0x343   :  { %844 = vsyncpa [#allocation5 + $0x1], 1 }
 0x344   :  { %845 = vsyncpa [#allocation8], 1 }
 0x345   :  { %847 = vsyncpa [#allocation8 + $0x1], 1 }
 0x346   :  { %848 = vsyncpa [#allocation6], 1 }
 0x347   :  { %850 = vsyncpa [#allocation6 + $0x1], 1 }

</bundles_post_ra>
